<compile_context>
chip_gen: v7x
topology: tpu7x:2x2x1
jax: 0.10.0
libtpu: 0.0.40
codegen_flags: <defaults>
</compile_context>

<pallas_src>
import math
import functools

import numpy as np
import jax
import jax.numpy as jnp
from jax.experimental import pallas as pl
from jax.experimental.pallas import tpu as pltpu


def _largest_divisor(n, cap, quantum):
    """Largest d | n with d <= cap and (d % quantum == 0 or d == n); falls back to n."""
    best = None
    i = 1
    while i * i <= n:
        if n % i == 0:
            for cand in (i, n // i):
                if cand <= cap and (cand % quantum == 0 or cand == n):
                    if best is None or cand > best:
                        best = cand
        i += 1
    return n if best is None else best


def _vmem_budgets():
    """(x_block_target_bytes, vmem_limit_bytes) scaled to this chip's VMEM."""
    try:
        cap = int(pltpu.get_tpu_info().vmem_capacity_bytes)
    except Exception:
        cap = 64 * 1024 * 1024
    x_block_target = max(2 * 1024 * 1024, cap // 16)          # ~8 MiB v5e/v6e, ~4 MiB v7x
    vmem_limit = max(32 * 1024 * 1024, min(cap // 2, 96 * 1024 * 1024))
    return x_block_target, vmem_limit


def _modconv1x1_kernel(style_ref, w_ref, b_ref, x_ref, o_ref):
    # style_ref: (1, 1, C) f32      — per-batch modulation (resident per b)
    # w_ref:     (3, C)    f32      — weight with equalized-lr scale pre-folded
    # b_ref:     (3, 1)    f32
    # x_ref:     (1, C, hw_tile)    — native dtype (f32 or bf16)
    # o_ref:     (1, 3, hw_tile)    — bf16 intermediate (skip path) or x dtype
    w_mod = w_ref[...] * style_ref[0]                          # (3, C) f32
    acc = jnp.dot(w_mod.astype(x_ref.dtype), x_ref[0],
                  preferred_element_type=jnp.float32)          # (3, hw_tile) f32
    o_ref[0] = (acc + b_ref[...]).astype(o_ref.dtype)


def _upsample_add_kernel(sp_ref, u_ref, base_ref, o_ref, *, rt, k1f):
    # sp_ref:   (1, 3, Hs+2, Ws) bf16 — skip, row-padded by 1, resident per batch
    # u_ref:    (Ws, 2*Ws)      bf16 — column polyphase upsample+FIR matrix
    # base_ref: (1, 3, rt, 2W)  bf16 — modconv output, row-pair view
    # o_ref:    (1, 3, rt, 2W)  out dtype
    a0, a1, a2, a3 = k1f
    w_img = u_ref.shape[1]                                     # = W = 2*Ws
    # r0 is t*rt; the tile picker guarantees rt % 8 == 0 whenever the grid has
    # more than one row step, so the alignment hint is always valid.
    r0 = pl.multiple_of(pl.program_id(1) * rt, 8)
    for ch in range(3):                                        # 3 RGB channels, unrolled
        rows = sp_ref[0, ch, pl.ds(r0, rt + 2), :]             # (rt+2, Ws) bf16 halo slice
        # Column upsample + FIR on the MXU (bf16 operands, f32 accumulation).
        cu = jnp.dot(rows, u_ref[...],
                     preferred_element_type=jnp.float32)       # (rt+2, W) f32
        # Row upsample + FIR: out[2r] / out[2r+1] phases (VPU, static slices).
        even = a0 * cu[0:rt, :] + a2 * cu[1:rt + 1, :]
        odd = a1 * cu[1:rt + 1, :] + a3 * cu[2:rt + 2, :]
        # Fused residual add; even/odd rows are contiguous halves of the 2W view.
        base_e = base_ref[0, ch, :, 0:w_img].astype(jnp.float32)
        base_o = base_ref[0, ch, :, w_img:2 * w_img].astype(jnp.float32)
        o_ref[0, ch, :, 0:w_img] = (base_e + even).astype(o_ref.dtype)
        o_ref[0, ch, :, w_img:2 * w_img] = (base_o + odd).astype(o_ref.dtype)


class ToRGB:
    """JAX/Pallas equivalent of the PyTorch ToRGB module (demodulate=False, k=1)."""

    def __init__(self, in_channel, style_dim, upsample=True,
                 blur_kernel=(1, 3, 3, 1), *, key):
        self.in_channel = in_channel
        scale = 1.0 / math.sqrt(in_channel)                    # fan_in = in_channel * 1 * 1
        # torch: randn(1, 3, in_channel, 1, 1); equalized-lr scale folded in.
        w = jax.random.normal(key, (3, in_channel), dtype=jnp.float32)
        self.weight = w * jnp.float32(scale)
        self.bias = jnp.zeros((3, 1), dtype=jnp.float32)       # torch: zeros(1, 3, 1, 1)
        self.upsample = upsample
        if upsample:
            assert len(blur_kernel) == 4, "polyphase path assumes a 4-tap blur kernel"
            # Separable 1-D FIR: make_kernel(k) * factor**2 = (k/sum(k)*2) outer itself.
            k1 = np.asarray(blur_kernel, np.float64)
            k1 = k1 / k1.sum() * 2.0
            k1 = k1[::-1]                                      # upfirdn2d flips the FIR
            # With up=2, pad=(2,1) the output phases are (per axis):
            #   out[2r]   = k1f[0]*skip[r-1] + k1f[2]*skip[r]
            #   out[2r+1] = k1f[1]*skip[r]   + k1f[3]*skip[r+1]
            self._k1f = tuple(float(v) for v in k1)
            self._u_cache = {}

    def _col_matrix(self, ws):
        """(Ws, 2*Ws) bf16 matrix doing the column zero-upsample + FIR (polyphase)."""
        u = self._u_cache.get(ws)
        if u is None:
            a0, a1, a2, a3 = self._k1f
            m = np.zeros((ws, 2 * ws), np.float32)
            c = np.arange(ws)
            m[c, 2 * c] = a2                                   # skip[c]   -> out[2c]
            m[c, 2 * c + 1] = a1                               # skip[c]   -> out[2c+1]
            if ws > 1:
                m[c[1:] - 1, 2 * c[1:]] = a0                   # skip[c-1] -> out[2c]
                m[c[:-1] + 1, 2 * c[:-1] + 1] = a3             # skip[c+1] -> out[2c+1]
            u = jnp.asarray(m, dtype=jnp.bfloat16)
            self._u_cache[ws] = u
        return u

    # --- hot path 1: grouped modulated 1x1 conv + bias (Pallas, HW-tiled) ---
    def _modulated_conv(self, x, style, out_dtype):
        B, C, H, W = x.shape
        hw = H * W
        x_flat = x.reshape(B, C, hw)                           # free reshape, native dtype
        style3 = style.reshape(B, 1, C).astype(jnp.float32)
        elem = jnp.dtype(x.dtype).itemsize
        x_block_target, vmem_limit = _vmem_budgets()
        # x-block target scaled to VMEM; tile divides HW, lane-aligned (or full).
        hw_tile = _largest_divisor(
            hw, max(128, x_block_target // max(1, C * elem)), 128)
        out = pl.pallas_call(
            _modconv1x1_kernel,
            out_shape=jax.ShapeDtypeStruct((B, 3, hw), out_dtype),
            grid_spec=pltpu.PrefetchScalarGridSpec(
                num_scalar_prefetch=0,
                grid=(B, hw // hw_tile),
                in_specs=[
                    pl.BlockSpec((1, 1, C), lambda b, t: (b, 0, 0)),        # style
                    pl.BlockSpec((3, C), lambda b, t: (0, 0)),              # weight
                    pl.BlockSpec((3, 1), lambda b, t: (0, 0)),              # bias
                    pl.BlockSpec((1, C, hw_tile), lambda b, t: (b, 0, t)),  # x
                ],
                out_specs=pl.BlockSpec((1, 3, hw_tile), lambda b, t: (b, 0, t)),
            ),
            compiler_params=pltpu.CompilerParams(
                dimension_semantics=("parallel", "parallel"),
                vmem_limit_bytes=vmem_limit),
        )(style3, self.weight, self.bias, x_flat)
        return out                                             # (B, 3, H*W)

    # --- hot path 2: polyphase upfirdn2d(up=2) on skip, fused residual add ---
    def _upsample_skip_add(self, skip, base_flat, H, W, out_dtype):
        B, c3, Hs, Ws = skip.shape                             # c3 == 3
        assert c3 == 3 and H == 2 * Hs and W == 2 * Ws
        # Rows-only halo pad fused with the bf16 cast (one cheap XLA op on the
        # small 3-channel skip); no column pad, no f32 upcast in HBM.
        sp = jnp.pad(skip.astype(jnp.bfloat16),
                     ((0, 0), (0, 0), (1, 1), (0, 0)))
        u = self._col_matrix(Ws)                               # (Ws, 2*Ws) bf16
        base = base_flat.reshape(B, 3, Hs, 2 * W)              # row-pair view (free)
        _, vmem_limit = _vmem_budgets()
        # Row tile (skip rows): <=64 (bounds the f32 `cu` temp), 8-aligned,
        # divides Hs (falls back to a single full tile).
        rt = _largest_divisor(Hs, 64, 8)
        kern = functools.partial(_upsample_add_kernel, rt=rt, k1f=self._k1f)
        out = pl.pallas_call(
            kern,
            out_shape=jax.ShapeDtypeStruct((B, 3, Hs, 2 * W), out_dtype),
            grid_spec=pltpu.PrefetchScalarGridSpec(
                num_scalar_prefetch=0,
                grid=(B, Hs // rt),
                in_specs=[
                    pl.BlockSpec((1, 3, Hs + 2, Ws), lambda b, t: (b, 0, 0, 0)),
                    pl.BlockSpec((Ws, 2 * Ws), lambda b, t: (0, 0)),
                    pl.BlockSpec((1, 3, rt, 2 * W), lambda b, t: (b, 0, t, 0)),
                ],
                out_specs=pl.BlockSpec((1, 3, rt, 2 * W), lambda b, t: (b, 0, t, 0)),
            ),
            compiler_params=pltpu.CompilerParams(
                dimension_semantics=("parallel", "parallel"),
                vmem_limit_bytes=vmem_limit),
        )(sp, u, base)
        return out.reshape(B, 3, H, W)

    def __call__(self, x, style, skip=None):
        B, C, H, W = x.shape
        out_dtype = x.dtype
        if skip is not None:
            # bf16 intermediate halves the base write+read HBM traffic.
            base_flat = self._modulated_conv(x, style, jnp.bfloat16)
            return self._upsample_skip_add(skip, base_flat, H, W, out_dtype)
        out_flat = self._modulated_conv(x, style, out_dtype)
        return out_flat.reshape(B, 3, H, W)


# ----------------------------- pure-JAX reference ---------------------------
def _ref_upsample2x(skip, k1f):
    a0, a1, a2, a3 = k1f
    B, C, Hs, Ws = skip.shape
    sp = jnp.pad(skip, ((0, 0), (0, 0), (1, 1), (1, 1)))
    ce = a0 * sp[..., 0:Ws] + a2 * sp[..., 1:Ws + 1]
    co = a1 * sp[..., 1:Ws + 1] + a3 * sp[..., 2:Ws + 2]
    cu = jnp.stack([ce, co], axis=-1).reshape(B, C, Hs + 2, 2 * Ws)
    re = a0 * cu[:, :, 0:Hs] + a2 * cu[:, :, 1:Hs + 1]
    ro = a1 * cu[:, :, 1:Hs + 1] + a3 * cu[:, :, 2:Hs + 2]
    return jnp.stack([re, ro], axis=3).reshape(B, C, 2 * Hs, 2 * Ws)


def _ref_forward(m, x, style, skip=None):
    w_mod = m.weight[None] * style[:, None, :].astype(jnp.float32)     # (B,3,C)
    out = jnp.einsum('boc,bchw->bohw', w_mod, x.astype(jnp.float32))
    out = out + m.bias.reshape(1, 3, 1, 1)
    if skip is not None:
        out = out + _ref_upsample2x(skip.astype(jnp.float32), m._k1f)
    return out


if __name__ == "__main__":
    key = jax.random.PRNGKey(0)
    kx, ks, kskip, kw = jax.random.split(key, 4)

    B, C, H, W = 2, 8, 16, 16
    style_dim = 32  # unused by forward: modulation is applied externally via get_latent

    x = jax.random.normal(kx, (B, C, H, W), dtype=jnp.float32)
    style = jax.random.normal(ks, (B, C), dtype=jnp.float32)           # modulated latent
    skip = jax.random.normal(kskip, (B, 3, H // 2, W // 2), dtype=jnp.float32)

    torgb = ToRGB(C, style_dim, upsample=True, key=kw)

    out_with_skip = torgb(x, style, skip=skip)
    out_no_skip = torgb(x, style)
    jax.block_until_ready((out_with_skip, out_no_skip))

    assert out_with_skip.shape == (B, 3, H, W)
    assert out_no_skip.shape == (B, 3, H, W)

    # Correctness vs pure-JAX reference (bf16 intermediate / bf16 FIR -> loose tol).
    ref_skip = _ref_forward(torgb, x, style, skip=skip)
    ref_plain = _ref_forward(torgb, x, style)
    np.testing.assert_allclose(np.asarray(out_no_skip), np.asarray(ref_plain),
                               rtol=1e-5, atol=1e-5)
    np.testing.assert_allclose(np.asarray(out_with_skip), np.asarray(ref_skip),
                               rtol=5e-2, atol=5e-2)

    print("KERNEL_OK")
</pallas_src>

<mosaic_0001>
module attributes {stable_mosaic.version = 11 : i64} {
  func.func @_modconv1x1_kernel(%arg0: i32, %arg1: i32, %arg2: memref<1x1x8xf32, #tpu.memory_space<vmem>>, %arg3: memref<3x8xf32, #tpu.memory_space<vmem>>, %arg4: memref<3x1xf32, #tpu.memory_space<vmem>>, %arg5: memref<1x8x256xf32, #tpu.memory_space<vmem>>, %arg6: memref<1x3x256xbf16, #tpu.memory_space<vmem>>) attributes {dimension_semantics = [#tpu.dimension_semantics<parallel>, #tpu.dimension_semantics<parallel>], iteration_bounds = array<i64: 2, 1>, scalar_prefetch = 0 : i64, scratch_operands = 0 : i64, tpu.core_type = #tpu.core_type<tc>, window_params = [{transform_indices = @transform_0, window_bounds = array<i64: 1, 1, 8>}, {pipeline_mode = #tpu.pipeline_mode<synchronous>, transform_indices = @transform_1, window_bounds = array<i64: 3, 8>}, {pipeline_mode = #tpu.pipeline_mode<synchronous>, transform_indices = @transform_2, window_bounds = array<i64: 3, 1>}, {transform_indices = @transform_3, window_bounds = array<i64: 1, 8, 256>}, {transform_indices = @transform_4, window_bounds = array<i64: 1, 3, 256>}]} {
    %c0 = arith.constant 0 : index
    %c0_0 = arith.constant 0 : index
    %0 = vector.load %arg3[%c0, %c0_0] : memref<3x8xf32, #tpu.memory_space<vmem>>, vector<3x8xf32>
    %c0_1 = arith.constant 0 : index
    %c0_2 = arith.constant 0 : index
    %c0_3 = arith.constant 0 : index
    %1 = vector.load %arg2[%c0_1, %c0_2, %c0_3] : memref<1x1x8xf32, #tpu.memory_space<vmem>>, vector<1x1x8xf32>
    %2 = vector.shape_cast %1 : vector<1x1x8xf32> to vector<1x8xf32>
    %3 = vector.broadcast %2 : vector<1x8xf32> to vector<3x8xf32>
    %4 = arith.mulf %0, %3 : vector<3x8xf32>
    %c0_4 = arith.constant 0 : index
    %c0_5 = arith.constant 0 : index
    %c0_6 = arith.constant 0 : index
    %5 = vector.load %arg5[%c0_4, %c0_5, %c0_6] : memref<1x8x256xf32, #tpu.memory_space<vmem>>, vector<1x8x256xf32>
    %6 = vector.shape_cast %5 : vector<1x8x256xf32> to vector<8x256xf32>
    %cst = arith.constant dense<0.000000e+00> : vector<3x256xf32>
    %7 = tpu.matmul %4, %6, %cst {dimension_numbers = #tpu.dot_dimension_numbers<[1], [0], [0], [1], [0, 0, 1, 1], [], []>} : vector<3x8xf32>, vector<8x256xf32>, vector<3x256xf32> -> vector<3x256xf32>
    %c0_7 = arith.constant 0 : index
    %c0_8 = arith.constant 0 : index
    %8 = vector.load %arg4[%c0_7, %c0_8] : memref<3x1xf32, #tpu.memory_space<vmem>>, vector<3x1xf32>
    %9 = vector.broadcast %8 : vector<3x1xf32> to vector<3x256xf32>
    %10 = arith.addf %7, %9 : vector<3x256xf32>
    %11 = arith.truncf %10 : vector<3x256xf32> to vector<3x256xbf16>
    %c0_9 = arith.constant 0 : index
    %c0_10 = arith.constant 0 : index
    %c0_11 = arith.constant 0 : index
    %12 = vector.load %arg6[%c0_9, %c0_10, %c0_11] : memref<1x3x256xbf16, #tpu.memory_space<vmem>>, vector<1x3x256xbf16>
    %13 = vector.shape_cast %12 : vector<1x3x256xbf16> to vector<3x256xbf16>
    %14 = vector.shape_cast %11 : vector<3x256xbf16> to vector<1x3x256xbf16>
    tpu.vector_store %arg6[%c0_9, %c0_10, %c0_11], %14 {strides = array<i32>} : memref<1x3x256xbf16, #tpu.memory_space<vmem>>, vector<1x3x256xbf16>,
    return
  }
  func.func @transform_0(%arg0: i32, %arg1: i32) -> (i32, i32, i32) {
    %c0_i32 = arith.constant 0 : i32
    %c0_i32_0 = arith.constant 0 : i32
    %c0_i32_1 = arith.constant 0 : i32
    return %arg0, %c0_i32, %c0_i32_0 : i32, i32, i32
  }
  func.func @transform_1(%arg0: i32, %arg1: i32) -> (i32, i32) {
    %c0_i32 = arith.constant 0 : i32
    %c0_i32_0 = arith.constant 0 : i32
    %c0_i32_1 = arith.constant 0 : i32
    return %c0_i32, %c0_i32_0 : i32, i32
  }
  func.func @transform_2(%arg0: i32, %arg1: i32) -> (i32, i32) {
    %c0_i32 = arith.constant 0 : i32
    %c0_i32_0 = arith.constant 0 : i32
    %c0_i32_1 = arith.constant 0 : i32
    return %c0_i32, %c0_i32_0 : i32, i32
  }
  func.func @transform_3(%arg0: i32, %arg1: i32) -> (i32, i32, i32) {
    %c0_i32 = arith.constant 0 : i32
    %c0_i32_0 = arith.constant 0 : i32
    return %arg0, %c0_i32, %arg1 : i32, i32, i32
  }
  func.func @transform_4(%arg0: i32, %arg1: i32) -> (i32, i32, i32) {
    %c0_i32 = arith.constant 0 : i32
    %c0_i32_0 = arith.constant 0 : i32
    return %arg0, %c0_i32, %arg1 : i32, i32, i32
  }
}

</mosaic_0001>

<bundles_post_ra>
// kernel: tpu_custom_call.1
= control target key start
LH: loop header
LB: loop body
LE: loop exit
PB: predicated region body
PF: predicated region fallthrough
CT: control target
= control target key end

     0   :  { %9 = vsyncpa [#allocation3], 0  ;;  %s803_s0 = inlined_call_operand.vmem [shape: f32[2,1,8], index: 0, kind: input, shape index: {}]   ;;  %s804_s1 = inlined_call_operand.vmem [shape: f32[3,8], index: 1, kind: input, shape index: {}]   ;;  %s805_s2 = inlined_call_operand.vmem [shape: f32[3,1], index: 2, kind: input, shape index: {}]   ;;  %s806_s3 = inlined_call_operand.hbm [shape: f32[2,8,256], index: 3, kind: input, shape index: {}]   ;;  %s807_s4 = inlined_call_operand.vmem [shape: bf16[2,3,256], index: 4, kind: output, shape index: {}]  }
   0x1   :  { %11 = vsyncpa [#allocation3 + $0x1], 0  ;;  %s665_s15 = smov 0   ;;  %s667_s16 = smov 0  }
   0x2   :  { %s669_s17 = smov 0   ;;  %s671_s18 = smov 0  }
   0x3   :  { %s673_s19 = smov 0   ;;  %s675_s20 = smov 0  }
   0x4 LB: > { %s477_s21 = sadd.s32 4294967295, %s634_s20   ;;  %s29_s22 = sadd.s32 1, %s630_s19  ;;  %s634_s20 = sphi %s675_s20, %s17_s20   ;;  %s630_s19 = sphi %s673_s19, %s817_s19   ;;  %s626_s18 = sphi %s671_s18, %s816_s18   ;;  %s622_s17 = sphi %s669_s17, %s815_s17   ;;  %s618_s16 = sphi %s667_s16, %s814_s16   ;;  %s614_s15 = sphi %s665_s15, %s813_s15  }
   0x5   : > { %p31_p0 = scmp.ge.s32.totalorder %s29_s22, 2  ;;  %s106_s23 = sadd.s32 1, %s622_s17 }
   0x6   : > { %p113_p1 = scmp.ne.s32.totalorder %s622_s17, %s618_s16  ;;  %p114_p2 = scmp.eq.s32.totalorder %s634_s20, 0 }
   0x7   : > { %s819_s22 = smov (%p31_p0, %s29_s22), 0  ;;  %p119_p4 = scmp.ne.s32.totalorder %s618_s16, %s614_s15 }
   0x8   : > { %p701_p3 = por %p114_p2, %p113_p1  ;;  %s101_s25 = ssub.s32 %s630_s19, %s819_s22 }
   0x9   : > { %p120_p5 = scmp.eq.s32.totalorder %s477_s21, 0  ;;  %p104_p6 = scmp.eq.s32.totalorder %s101_s25, 0 }
   0xa   : > { %p501_p8 = scmp.lt.s32.totalorder %s634_s20, 2  ;;  %s183_s28 = sand.u32 1, %s622_s17  }
   0xb   : > { %p708_p7 = por %p120_p5, %p119_p4  ;;  %s493_s29 = sshll.u32 %s630_s19, 8 }
   0xc   : > { %s714_s27 = scalar_select %p104_p6, %s622_s17, %s106_s23  }
   0xd   : > { %s481_s30 = sshll.u32 %s183_s28, 4  ;;  %s721_s7 = scalar_lea.hbm %s806_s3, %s493_s29 }
   0xe   : > { %s187_s8 = scalar_lea.vmem [#allocation2], %s481_s30  ;;  %p725_p9 = pnand %p501_p8, %p701_p3 }
   0xf   : > { %s197_s9 = sshll.u32 %s187_s8, 4  ;;  %s184_s11 = scalar_lea.sflag [#allocation3], %s183_s28  ;;  %s729_s9 = int_to_ptr.vmem [resolvable:$true] %s197_s9 }
  0x10   : > { %s554_s12 = scalar_lea.hbm %s721_s7, 256  ;;  %p556_p13 = pneg %p725_p9 }
  0x11   : > { %p555_p12 = scmp.ne.s32.totalorder %s721_s7, %s554_s12  ;;  %s559_s15 = scalar_lea.hbm %s806_s3, 512 }
  0x12   : > { %p560_p2 = scmp.lt.u32.totalorder %s721_s7, %s806_s3  ;;  %p561_p3 = scmp.lt.u32.totalorder %s559_s15, %s554_s12 }
  0x13   : > { %p557_p0 = pnand %p556_p13, %p555_p12  ;;  %p563_p5 = scmp.lt.u32.totalorder %s554_s12, %s721_s7 }
  0x14   : > { %p562_p4 = por %p561_p3, %p560_p2 }
  0x15   : > { %p558_p1 = pneg %p557_p0 }
  0x16   : > { %p564_p6 = por %p563_p5, %p562_p4 }
  0x18   : > { %p565_p8 = pnand %p564_p6, %p558_p1 }
  0x1a   : > { %568 = shalt.err (!%p565_p8)
}
  0x1b   : > { %s569_s24 = scalar_lea.vmem %s729_s9, 256  ;;  %s636_s25 = smov [#allocation2]  }
  0x1c   : > { %p570_p12 = scmp.ne.s32.totalorder %s729_s9, %s569_s24  ;;  %s574_s28 = sshll.u32 %s636_s25, 4  ;;  %s575_s28 = int_to_ptr.vmem [resolvable:$false] %s574_s28 }
  0x1d   : > { %s576_s29 = scalar_lea.vmem %s575_s28, 512  ;;  %p577_p11 = scmp.lt.s32.totalorder %s729_s9, %s575_s28 }
  0x1e   : > { %p572_p0 = pnand %p570_p12, %p556_p13  ;;  %p578_p2 = scmp.lt.s32.totalorder %s576_s29, %s569_s24 }
  0x20   : > { %p573_p10 = pneg %p572_p0  ;;  %p579_p3 = por %p578_p2, %p577_p11 }
  0x22   : > { %p580_p4 = pnand %p579_p3, %p573_p10 }
  0x24   : > { %583 = shalt.err (!%p580_p4)
}
  0x25   : > { %500 = dma.hbm_to_vmem [thread:$0]  (!%p725_p9), %s721_s7, 256, %s729_s9, %s184_s11  }
  0x26   : > { %p811_p1 = scmp.lt.s32.totalorder %s634_s20, 3  ;;  %p812_p5 = scmp.ge.s32.totalorder %s634_s20, 1 }
  0x28   : > { %p203_p13 = pnand %p812_p5, %p811_p1 }
  0x29   : > { %s208_s30 = sand.u32 (!%p203_p13), 1, %s618_s16  }
  0x2a   : > { %206 = sbr.rel (%p203_p13) target bundleno = 278 (0x116), region = 36  ;;  %s485_s5 = sshll.u32 (!%p203_p13), %s208_s30, 4 }
  0x2b   : > { %s209_s6 = scalar_lea.sflag (!%p203_p13), [#allocation3], %s208_s30  ;;  %s212_s8 = scalar_lea.vmem (!%p203_p13), [#allocation2], %s485_s5 }
  0x31   : > { %609 = dma.done.wait (%p708_p7), %s209_s6, 256  }
  0x32   : > { %611 = vsyncadd (%p708_p7), %s209_s6, 4294967040  ;;  %p244_p10 = scmp.lt.s32.totalorder %s626_s18, 1  ;;  %v637_v0 = vmov 0.0   ;;  %v638_v1 = vmov 0   ;;  %v268_v2 = vld [vmem:[%s212_s8 + $0x8] sm:$0xff]  ;;  %v267_v3 = vld [vmem:[%s212_s8] sm:$0xff]  ;;  %v358_v10 = vlaneseq }
  0x33   : > { %343 = vmatprep.mubr.f32.mxu0 %v637_v0  ;;  %553 = vset.pattern.permute.xlu0 %v638_v1  ;;  %v258_v4 = vld [vmem:[%s804_s1] sm:$0x7]  ;;  %vm275_vm0 = vcmask 64512   ;;  %v639_v8 = vmov 1983009808   ;;  %vm363_vm1 = vcmask 1041408  }
  0x34   : > { %s821_s18 = smov (!%p244_p10, %s626_s18), 1  ;;  %279 = vmatprep.subr.mxu0 %v268_v2  ;;  %v269_v6 = vld [vmem:[%s805_s2] sm:$0x7]  ;;  %v356_v9 = vunpack.c.l.s4 %v639_v8  ;;  %v359_v13 = vshrl.u32 %v358_v10, 7  ;;  %vm364_vm2 = vsmask.f32 1280 }
  0x35   : > { %s246_s10 = scalar_lea.vmem %s803_s0, %s821_s18  ;;  %280 = vmatpush1.msra.mxu0 %v267_v3  ;;  %272 = vperm.xlu0 %553, %v269_v6   ;;  %s494_s14 = sshll.u32 %s821_s18, 2  ;;  %vm366_vm3 = vcmask 1043458   ;;  %vm367_vm4 = vsmask.f32 3328  ;;  %vm365_vm5 = vmand %vm363_vm1, %vm364_vm2 }
  0x36   : > { %v488_v5 = vld [vmem:[%s246_s10] ss:$0 sm:$0xff]  ;;  %v357_v12 = vunpack.c.0.s8 %v356_v9  ;;  %s256_s23 = scalar_lea.vmem %s807_s4, %s494_s14  ;;  %vm368_vm6 = vmand %vm366_vm3, %vm367_vm4 }
  0x37   : > { %v266_v7 = vmul.f32 %v488_v5, %v258_v4  ;;  %vm369_vm7 = vmor %vm368_vm6, %vm365_vm5  ;;  %v370_v20 = vld [vmem:[%s256_s23] sm:$0xf] }
  0x38   : > { %v360_v18 = vsub.s32 %v357_v12, %v359_v13 }
  0x39   : > { %489 = vmatmul.mubr.msk.f32.vlgmr.msra.gmra.mrb[0].mxu0 %vm275_vm0, %v266_v7 }
  0xb4   : > { %v273_v11 = vpop.permute.xlu0 %272 }
 0x10c   : > { %v345_v14 = vpop.f32.mrb[0].mxu0 }
 0x10d   : > { %v346_v15 = vadd.f32 %v345_v14, %v273_v11  ;;  %v347_v16 = vpop.f32.mrb[1].mxu0 }
 0x10e   : > { %v348_v17 = vadd.f32 %v347_v16, %v273_v11 }
 0x110   : > { %v490_v19 = vpack.c.bf16 %v348_v17, %v346_v15 }
 0x112   : > { %v361_v21 = vrot.slane %v490_v19, %v360_v18 }
 0x114   : > { %v371_v22 = vsel %vm369_vm7, %v361_v21, %v370_v20 }
 0x115   : > { %372 = vst [vmem:[%s256_s23] sm:$0xf] %v371_v22 }
 0x116 PF: > { %s17_s20 = sadd.s32 1, %s634_s20   ;;  %s813_s15 = smov %s618_s16 }
 0x117   : > { %p14_p7 = scmp.ge.s32.totalorder %s17_s20, 4   ;;  %s814_s16 = smov %s622_s17 }
 0x118   : > { %s815_s17 = smov %s714_s27  ;;  %s816_s18 = smov %s630_s19 }
 0x119   : > { %s817_s19 = smov %s819_s22  ;;  %16 = sbr.rel (!%p14_p7) target bundleno = 4 (0x4), region = 79 }
 0x120   :  { %403 = vsyncpa [#allocation3], 1 }
 0x121   :  { %405 = vsyncpa [#allocation3 + $0x1], 1 }

</bundles_post_ra>
